<compile_context>
chip_gen: v6e
topology: v6e:2x2x1
jax: 0.10.0
libtpu: 0.0.40
codegen_flags: <defaults>
</compile_context>

<pallas_src>
import functools
import math

import numpy as np
import jax
import jax.numpy as jnp
from jax.experimental import pallas as pl
from jax.experimental.pallas import tpu as pltpu


def _round_up(x, m):
    return ((x + m - 1) // m) * m


def _default_gate_dtype():
    """bf16 gate math on chips with a bf16 VALU (v6e / v7x); f32 otherwise (v5e, ...)."""
    try:
        kind = jax.devices()[0].device_kind.lower()
    except Exception:
        return jnp.float32
    if ("v6" in kind) or ("v7" in kind) or ("tpu7" in kind):
        return jnp.bfloat16
    return jnp.float32


def _pack_gate(params):
    """Fold |w2| into (w1, b1), reorder hidden units sign(+)-first.

    Exact rewrite:  b2 + sum_j w2_j*relu(s*w1_j+b1_j)
                 =  b2 + sum_{+} relu(s*w1f_j+b1f_j) - sum_{-} relu(s*w1f_j+b1f_j)
    (relu is positively homogeneous).  Returns compile-time constants.
    """
    w1, b1, w2, b2 = params
    w1 = np.asarray(jax.device_get(w1), np.float64).reshape(-1)
    b1 = np.asarray(jax.device_get(b1), np.float64).reshape(-1)
    w2 = np.asarray(jax.device_get(w2), np.float64).reshape(-1)
    b2 = float(np.asarray(jax.device_get(b2), np.float64).reshape(()))
    order = np.argsort(w2 < 0, kind="stable")          # '+'-sign hidden units first
    n_pos = int(np.sum(w2 >= 0))
    w1f = tuple(float(v) for v in (w1 * np.abs(w2))[order])
    b1f = tuple(float(v) for v in (b1 * np.abs(w2))[order])
    return (w1f, b1f, b2, n_pos)


def _gate_mlp(s32, w1f, b1f, b2, n_pos, gate_dtype):
    """Elementwise sigmoid(b2 + sum_j +/- relu(s*w1f_j + b1f_j)) on a lane-dense tile.

    The hidden loop (the VALU-critical path) runs in `gate_dtype`; the sigmoid is f32.
    4 VPU ops per hidden unit: mul, add, relu, +/- accumulate.
    """
    s = s32.astype(gate_dtype)
    acc = jnp.zeros_like(s)
    for j, (w, b) in enumerate(zip(w1f, b1f)):          # static unroll, hidden small
        h = jnp.maximum(s * w + b, 0.0)                 # python-float consts stay weak
        acc = acc + h if j < n_pos else acc - h
    a = acc.astype(jnp.float32) + b2
    a = jnp.maximum(a, -30.0)       # exp(-a) <= e^30: no inf into the approx reciprocal
    return pl.reciprocal(1.0 + jnp.exp(-a), approx=True)   # EUP exp + EUP recip


def _vector_mlp_kernel(x_ref, w1_ref, w2_ref, s_ref, st_ref, o_ref, *,
                       g1, g2, gate_dtype):
    """One (TM, K*N) lane-dense row tile.

    x_ref  : VMEM (TM, KNp)   flattened token vectors
    w1_ref : VMEM (KNp, KNp)  kron(mix1^T, I_n)  (constant block -> resident)
    w2_ref : VMEM (KNp, KNp)  kron(mix2^T, I_n)
    s_ref  : VMEM (KNp, Kp)   kron(I_K, ones(n,1))   per-vector norm sum
    st_ref : VMEM (Kp, KNp)   kron(I_K, ones(1,n))   norm replicate over n lanes
    o_ref  : VMEM (TM, KNp)
    """
    x = x_ref[...].astype(jnp.float32)                                    # (TM, KNp)

    z = jnp.dot(x, w1_ref[...], preferred_element_type=jnp.float32)      # mix1 over k
    n1 = jnp.dot(jnp.dot(z * z, s_ref[...], preferred_element_type=jnp.float32),
                 st_ref[...], preferred_element_type=jnp.float32)        # (TM, KNp)
    z = z * _gate_mlp(n1, *g1, gate_dtype)

    u = jnp.dot(z, w2_ref[...], preferred_element_type=jnp.float32)      # mix2 over k
    n2 = jnp.dot(jnp.dot(u * u, s_ref[...], preferred_element_type=jnp.float32),
                 st_ref[...], preferred_element_type=jnp.float32)
    y = u * _gate_mlp(n2, *g2, gate_dtype)

    o_ref[...] = (x + y).astype(o_ref.dtype)                             # residual


def vector_mlp(X, mix1, mix2, g1_params, g2_params, *, gate_dtype=None, tm=None):
    """Pallas implementation of VectorMLP.forward.  X: (B, T, K, N) -> (B, T, K, N)."""
    B, T, K, N = X.shape
    M, KN = B * T, K * N
    f32 = jnp.float32
    if gate_dtype is None:
        gate_dtype = _default_gate_dtype()

    # Lane padding: keep the flattened (k, n) axis an exact multiple of 128 so every
    # store is a full-width vst (sub-128 widths become masked partial stores).
    KNp = max(_round_up(KN, 128), 128)
    Kp = max(_round_up(K, 8), 8)

    # Row tiling: collapse (B, T) -> M rows, tile with large TM blocks (mult. of 8).
    if tm is None:
        tm = min(512, _round_up(M, 8))
    tm = max(8, _round_up(min(tm, _round_up(M, 8)), 8))
    Mp = _round_up(M, tm)

    x = jnp.pad(X.reshape(M, KN), ((0, Mp - M), (0, KNp - KN)))

    # Host glue: structured matrices (built once; constant-index blocks in the grid).
    eye_n = jnp.eye(N, dtype=f32)
    W1 = jnp.pad(jnp.kron(mix1.astype(f32).T, eye_n),
                 ((0, KNp - KN), (0, KNp - KN)))            # x @ W1 == mix1 over k
    W2 = jnp.pad(jnp.kron(mix2.astype(f32).T, eye_n),
                 ((0, KNp - KN), (0, KNp - KN)))
    S = jnp.pad(jnp.kron(jnp.eye(K, dtype=f32), jnp.ones((N, 1), f32)),
                ((0, KNp - KN), (0, Kp - K)))               # (KNp, Kp) group-sum
    ST = jnp.pad(jnp.kron(jnp.eye(K, dtype=f32), jnp.ones((1, N), f32)),
                 ((0, Kp - K), (0, KNp - KN)))              # (Kp, KNp) replicate

    g1 = _pack_gate(g1_params)
    g2 = _pack_gate(g2_params)

    # VMEM footprint is tiny at the default TM (<~4 MiB); only raise the scoped limit
    # if a caller pushes TM high enough that the f32 intermediates approach the
    # 32 MiB default (relevant on v7x where physical VMEM is 64 MiB).
    vmem_limit = None
    approx_bytes = 14 * tm * KNp * 4
    if approx_bytes > 24 * 1024 * 1024:
        vmem_limit = min(2 * approx_bytes, 60 * 1024 * 1024)

    kernel = functools.partial(_vector_mlp_kernel, g1=g1, g2=g2, gate_dtype=gate_dtype)
    out = pl.pallas_call(
        kernel,
        out_shape=jax.ShapeDtypeStruct((Mp, KNp), X.dtype),
        grid=(Mp // tm,),
        in_specs=[
            pl.BlockSpec((tm, KNp), lambda i: (i, 0)),      # x row tile
            pl.BlockSpec((KNp, KNp), lambda i: (0, 0)),     # W1 (constant block)
            pl.BlockSpec((KNp, KNp), lambda i: (0, 0)),     # W2 (constant block)
            pl.BlockSpec((KNp, Kp), lambda i: (0, 0)),      # S  (constant block)
            pl.BlockSpec((Kp, KNp), lambda i: (0, 0)),      # S^T (constant block)
        ],
        out_specs=pl.BlockSpec((tm, KNp), lambda i: (i, 0)),
        compiler_params=pltpu.CompilerParams(
            dimension_semantics=("parallel",),              # v7x: M tiles split over TCs
            vmem_limit_bytes=vmem_limit),
    )(x, W1, W2, S, ST)

    return out[:M, :KN].reshape(B, T, K, N)


def vector_mlp_ref(X, mix1, mix2, g1_params, g2_params):
    """Pure-JAX reference mirroring the PyTorch forward exactly (f32)."""
    def gate(s, params):                 # s: (..., 1)
        w1, b1, w2, b2 = params
        h = jax.nn.relu(s * w1.reshape(-1) + b1)                         # (..., hidden)
        out = jnp.sum(h * w2.reshape(-1), axis=-1, keepdims=True) + b2   # (..., 1)
        return jax.nn.sigmoid(out)

    Z = jnp.einsum('kl,btln->btkn', mix1, X)
    Z = gate((Z ** 2).sum(-1, keepdims=True), g1_params) * Z
    U = jnp.einsum('kl,btln->btkn', mix2, Z)
    Y = gate((U ** 2).sum(-1, keepdims=True), g2_params) * U
    return X + Y


if __name__ == "__main__":
    # Small shapes consistent with the module: B=2, T=8, k=16 vectors of dim n=8, hidden=16.
    B, T, K, N, hidden = 2, 8, 16, 8, 16

    key = jax.random.PRNGKey(0)
    (k_m1, k_m2, k_w1a, k_b1a, k_w2a, k_b2a,
     k_w1b, k_b1b, k_w2b, k_b2b, k_x) = jax.random.split(key, 11)

    mix1 = jax.random.normal(k_m1, (K, K), jnp.float32) / math.sqrt(K)
    mix2 = jax.random.normal(k_m2, (K, K), jnp.float32) / math.sqrt(K)

    def linear_init(kw, kb, out_f, in_f):
        bound = 1.0 / math.sqrt(in_f)
        w = jax.random.uniform(kw, (out_f, in_f), jnp.float32, -bound, bound)
        b = jax.random.uniform(kb, (out_f,), jnp.float32, -bound, bound)
        return w, b

    g1_params = (*linear_init(k_w1a, k_b1a, hidden, 1), *linear_init(k_w2a, k_b2a, 1, hidden))
    g2_params = (*linear_init(k_w1b, k_b1b, hidden, 1), *linear_init(k_w2b, k_b2b, 1, hidden))

    X = jax.random.normal(k_x, (B, T, K, N), jnp.float32)

    ref = jax.block_until_ready(vector_mlp_ref(X, mix1, mix2, g1_params, g2_params))

    # Tight functional check: f32 gate path (error only from f32 MXU + approx reciprocal).
    out_f32 = jax.block_until_ready(
        vector_mlp(X, mix1, mix2, g1_params, g2_params, gate_dtype=jnp.float32))
    assert out_f32.shape == (B, T, K, N)
    assert bool(jnp.all(jnp.isfinite(out_f32)))
    err32 = float(jnp.max(jnp.abs(out_f32 - ref)))
    assert jnp.allclose(out_f32, ref, atol=5e-2, rtol=5e-2), f"f32 gate path max err {err32}"

    # Production config: gate-math dtype auto-selected per chip (bf16 VALU on v6e/v7x).
    gate_dtype = _default_gate_dtype()
    if jnp.dtype(gate_dtype) == jnp.dtype(jnp.float32):
        out = out_f32
    else:
        out = jax.block_until_ready(
            vector_mlp(X, mix1, mix2, g1_params, g2_params, gate_dtype=gate_dtype))
        assert out.shape == (B, T, K, N)
        assert bool(jnp.all(jnp.isfinite(out)))
        errbf = float(jnp.max(jnp.abs(out - ref)))
        # Loose bound for the bf16 gate path; the exact functional check is the f32 run above.
        assert jnp.allclose(out, ref, atol=2e-1, rtol=2e-1), f"bf16 gate path max err {errbf}"

    print("KERNEL_OK")
</pallas_src>

<mosaic_0001>
module attributes {stable_mosaic.version = 11 : i64} {
  func.func @_vector_mlp_kernel(%arg0: i32, %arg1: memref<16x128xf32, #tpu.memory_space<vmem>>, %arg2: memref<128x128xf32, #tpu.memory_space<vmem>>, %arg3: memref<128x128xf32, #tpu.memory_space<vmem>>, %arg4: memref<128x16xf32, #tpu.memory_space<vmem>>, %arg5: memref<16x128xf32, #tpu.memory_space<vmem>>, %arg6: memref<16x128xf32, #tpu.memory_space<vmem>>) attributes {dimension_semantics = [#tpu.dimension_semantics<parallel>], iteration_bounds = array<i64: 1>, scalar_prefetch = 0 : i64, scratch_operands = 0 : i64, tpu.core_type = #tpu.core_type<tc>, window_params = [{transform_indices = @transform_0, window_bounds = array<i64: 16, 128>}, {pipeline_mode = #tpu.pipeline_mode<synchronous>, transform_indices = @transform_1, window_bounds = array<i64: 128, 128>}, {pipeline_mode = #tpu.pipeline_mode<synchronous>, transform_indices = @transform_2, window_bounds = array<i64: 128, 128>}, {pipeline_mode = #tpu.pipeline_mode<synchronous>, transform_indices = @transform_3, window_bounds = array<i64: 128, 16>}, {pipeline_mode = #tpu.pipeline_mode<synchronous>, transform_indices = @transform_4, window_bounds = array<i64: 16, 128>}, {transform_indices = @transform_5, window_bounds = array<i64: 16, 128>}]} {
    %c0 = arith.constant 0 : index
    %c0_0 = arith.constant 0 : index
    %0 = vector.load %arg1[%c0, %c0_0] : memref<16x128xf32, #tpu.memory_space<vmem>>, vector<16x128xf32>
    %c0_1 = arith.constant 0 : index
    %c0_2 = arith.constant 0 : index
    %1 = vector.load %arg2[%c0_1, %c0_2] : memref<128x128xf32, #tpu.memory_space<vmem>>, vector<128x128xf32>
    %cst = arith.constant dense<0.000000e+00> : vector<16x128xf32>
    %2 = tpu.matmul %0, %1, %cst {dimension_numbers = #tpu.dot_dimension_numbers<[1], [0], [0], [1], [0, 0, 1, 1], [], []>} : vector<16x128xf32>, vector<128x128xf32>, vector<16x128xf32> -> vector<16x128xf32>
    %3 = arith.mulf %2, %2 : vector<16x128xf32>
    %c0_3 = arith.constant 0 : index
    %c0_4 = arith.constant 0 : index
    %4 = vector.load %arg4[%c0_3, %c0_4] : memref<128x16xf32, #tpu.memory_space<vmem>>, vector<128x16xf32>
    %cst_5 = arith.constant dense<0.000000e+00> : vector<16x16xf32>
    %5 = tpu.matmul %3, %4, %cst_5 {dimension_numbers = #tpu.dot_dimension_numbers<[1], [0], [0], [1], [0, 0, 1, 1], [], []>} : vector<16x128xf32>, vector<128x16xf32>, vector<16x16xf32> -> vector<16x16xf32>
    %c0_6 = arith.constant 0 : index
    %c0_7 = arith.constant 0 : index
    %6 = vector.load %arg5[%c0_6, %c0_7] : memref<16x128xf32, #tpu.memory_space<vmem>>, vector<16x128xf32>
    %cst_8 = arith.constant dense<0.000000e+00> : vector<16x128xf32>
    %7 = tpu.matmul %5, %6, %cst_8 {dimension_numbers = #tpu.dot_dimension_numbers<[1], [0], [0], [1], [0, 0, 1, 1], [], []>} : vector<16x16xf32>, vector<16x128xf32>, vector<16x128xf32> -> vector<16x128xf32>
    %cst_9 = arith.constant 0.000000e+00 : f32
    %8 = vector.broadcast %cst_9 : f32 to vector<16x128xf32>
    %cst_10 = arith.constant 0.0944172591 : f32
    %9 = vector.broadcast %cst_10 : f32 to vector<16x128xf32>
    %10 = arith.mulf %7, %9 : vector<16x128xf32>
    %cst_11 = arith.constant 0.0535758287 : f32
    %11 = vector.broadcast %cst_11 : f32 to vector<16x128xf32>
    %12 = arith.addf %10, %11 : vector<16x128xf32>
    %cst_12 = arith.constant 0.000000e+00 : f32
    %13 = vector.broadcast %cst_12 : f32 to vector<16x128xf32>
    %14 = arith.maximumf %12, %13 : vector<16x128xf32>
    %15 = arith.addf %8, %14 : vector<16x128xf32>
    %cst_13 = arith.constant 0.0625686198 : f32
    %16 = vector.broadcast %cst_13 : f32 to vector<16x128xf32>
    %17 = arith.mulf %7, %16 : vector<16x128xf32>
    %cst_14 = arith.constant 0.123360254 : f32
    %18 = vector.broadcast %cst_14 : f32 to vector<16x128xf32>
    %19 = arith.addf %17, %18 : vector<16x128xf32>
    %cst_15 = arith.constant 0.000000e+00 : f32
    %20 = vector.broadcast %cst_15 : f32 to vector<16x128xf32>
    %21 = arith.maximumf %19, %20 : vector<16x128xf32>
    %22 = arith.addf %15, %21 : vector<16x128xf32>
    %cst_16 = arith.constant -0.124906398 : f32
    %23 = vector.broadcast %cst_16 : f32 to vector<16x128xf32>
    %24 = arith.mulf %7, %23 : vector<16x128xf32>
    %cst_17 = arith.constant -0.102095768 : f32
    %25 = vector.broadcast %cst_17 : f32 to vector<16x128xf32>
    %26 = arith.addf %24, %25 : vector<16x128xf32>
    %cst_18 = arith.constant 0.000000e+00 : f32
    %27 = vector.broadcast %cst_18 : f32 to vector<16x128xf32>
    %28 = arith.maximumf %26, %27 : vector<16x128xf32>
    %29 = arith.addf %22, %28 : vector<16x128xf32>
    %cst_19 = arith.constant 0.0148380725 : f32
    %30 = vector.broadcast %cst_19 : f32 to vector<16x128xf32>
    %31 = arith.mulf %7, %30 : vector<16x128xf32>
    %cst_20 = arith.constant 0.0630429387 : f32
    %32 = vector.broadcast %cst_20 : f32 to vector<16x128xf32>
    %33 = arith.addf %31, %32 : vector<16x128xf32>
    %cst_21 = arith.constant 0.000000e+00 : f32
    %34 = vector.broadcast %cst_21 : f32 to vector<16x128xf32>
    %35 = arith.maximumf %33, %34 : vector<16x128xf32>
    %36 = arith.addf %29, %35 : vector<16x128xf32>
    %cst_22 = arith.constant -0.0898780301 : f32
    %37 = vector.broadcast %cst_22 : f32 to vector<16x128xf32>
    %38 = arith.mulf %7, %37 : vector<16x128xf32>
    %cst_23 = arith.constant -0.0759693608 : f32
    %39 = vector.broadcast %cst_23 : f32 to vector<16x128xf32>
    %40 = arith.addf %38, %39 : vector<16x128xf32>
    %cst_24 = arith.constant 0.000000e+00 : f32
    %41 = vector.broadcast %cst_24 : f32 to vector<16x128xf32>
    %42 = arith.maximumf %40, %41 : vector<16x128xf32>
    %43 = arith.addf %36, %42 : vector<16x128xf32>
    %cst_25 = arith.constant 0.159243166 : f32
    %44 = vector.broadcast %cst_25 : f32 to vector<16x128xf32>
    %45 = arith.mulf %7, %44 : vector<16x128xf32>
    %cst_26 = arith.constant 0.0382135026 : f32
    %46 = vector.broadcast %cst_26 : f32 to vector<16x128xf32>
    %47 = arith.addf %45, %46 : vector<16x128xf32>
    %cst_27 = arith.constant 0.000000e+00 : f32
    %48 = vector.broadcast %cst_27 : f32 to vector<16x128xf32>
    %49 = arith.maximumf %47, %48 : vector<16x128xf32>
    %50 = arith.addf %43, %49 : vector<16x128xf32>
    %cst_28 = arith.constant 0.139386639 : f32
    %51 = vector.broadcast %cst_28 : f32 to vector<16x128xf32>
    %52 = arith.mulf %7, %51 : vector<16x128xf32>
    %cst_29 = arith.constant -0.0807021856 : f32
    %53 = vector.broadcast %cst_29 : f32 to vector<16x128xf32>
    %54 = arith.addf %52, %53 : vector<16x128xf32>
    %cst_30 = arith.constant 0.000000e+00 : f32
    %55 = vector.broadcast %cst_30 : f32 to vector<16x128xf32>
    %56 = arith.maximumf %54, %55 : vector<16x128xf32>
    %57 = arith.subf %50, %56 : vector<16x128xf32>
    %cst_31 = arith.constant -0.0639300868 : f32
    %58 = vector.broadcast %cst_31 : f32 to vector<16x128xf32>
    %59 = arith.mulf %7, %58 : vector<16x128xf32>
    %cst_32 = arith.constant 0.182485849 : f32
    %60 = vector.broadcast %cst_32 : f32 to vector<16x128xf32>
    %61 = arith.addf %59, %60 : vector<16x128xf32>
    %cst_33 = arith.constant 0.000000e+00 : f32
    %62 = vector.broadcast %cst_33 : f32 to vector<16x128xf32>
    %63 = arith.maximumf %61, %62 : vector<16x128xf32>
    %64 = arith.subf %57, %63 : vector<16x128xf32>
    %cst_34 = arith.constant -0.0135284495 : f32
    %65 = vector.broadcast %cst_34 : f32 to vector<16x128xf32>
    %66 = arith.mulf %7, %65 : vector<16x128xf32>
    %cst_35 = arith.constant -0.0140383262 : f32
    %67 = vector.broadcast %cst_35 : f32 to vector<16x128xf32>
    %68 = arith.addf %66, %67 : vector<16x128xf32>
    %cst_36 = arith.constant 0.000000e+00 : f32
    %69 = vector.broadcast %cst_36 : f32 to vector<16x128xf32>
    %70 = arith.maximumf %68, %69 : vector<16x128xf32>
    %71 = arith.subf %64, %70 : vector<16x128xf32>
    %cst_37 = arith.constant 0.061021246 : f32
    %72 = vector.broadcast %cst_37 : f32 to vector<16x128xf32>
    %73 = arith.mulf %7, %72 : vector<16x128xf32>
    %cst_38 = arith.constant -0.201934144 : f32
    %74 = vector.broadcast %cst_38 : f32 to vector<16x128xf32>
    %75 = arith.addf %73, %74 : vector<16x128xf32>
    %cst_39 = arith.constant 0.000000e+00 : f32
    %76 = vector.broadcast %cst_39 : f32 to vector<16x128xf32>
    %77 = arith.maximumf %75, %76 : vector<16x128xf32>
    %78 = arith.subf %71, %77 : vector<16x128xf32>
    %cst_40 = arith.constant 0.00192945206 : f32
    %79 = vector.broadcast %cst_40 : f32 to vector<16x128xf32>
    %80 = arith.mulf %7, %79 : vector<16x128xf32>
    %cst_41 = arith.constant 0.0806221887 : f32
    %81 = vector.broadcast %cst_41 : f32 to vector<16x128xf32>
    %82 = arith.addf %80, %81 : vector<16x128xf32>
    %cst_42 = arith.constant 0.000000e+00 : f32
    %83 = vector.broadcast %cst_42 : f32 to vector<16x128xf32>
    %84 = arith.maximumf %82, %83 : vector<16x128xf32>
    %85 = arith.subf %78, %84 : vector<16x128xf32>
    %cst_43 = arith.constant -0.045521751 : f32
    %86 = vector.broadcast %cst_43 : f32 to vector<16x128xf32>
    %87 = arith.mulf %7, %86 : vector<16x128xf32>
    %cst_44 = arith.constant 0.0453312956 : f32
    %88 = vector.broadcast %cst_44 : f32 to vector<16x128xf32>
    %89 = arith.addf %87, %88 : vector<16x128xf32>
    %cst_45 = arith.constant 0.000000e+00 : f32
    %90 = vector.broadcast %cst_45 : f32 to vector<16x128xf32>
    %91 = arith.maximumf %89, %90 : vector<16x128xf32>
    %92 = arith.subf %85, %91 : vector<16x128xf32>
    %cst_46 = arith.constant -0.0814461857 : f32
    %93 = vector.broadcast %cst_46 : f32 to vector<16x128xf32>
    %94 = arith.mulf %7, %93 : vector<16x128xf32>
    %cst_47 = arith.constant -0.11703743 : f32
    %95 = vector.broadcast %cst_47 : f32 to vector<16x128xf32>
    %96 = arith.addf %94, %95 : vector<16x128xf32>
    %cst_48 = arith.constant 0.000000e+00 : f32
    %97 = vector.broadcast %cst_48 : f32 to vector<16x128xf32>
    %98 = arith.maximumf %96, %97 : vector<16x128xf32>
    %99 = arith.subf %92, %98 : vector<16x128xf32>
    %cst_49 = arith.constant 0.19222483 : f32
    %100 = vector.broadcast %cst_49 : f32 to vector<16x128xf32>
    %101 = arith.mulf %7, %100 : vector<16x128xf32>
    %cst_50 = arith.constant -0.0753738582 : f32
    %102 = vector.broadcast %cst_50 : f32 to vector<16x128xf32>
    %103 = arith.addf %101, %102 : vector<16x128xf32>
    %cst_51 = arith.constant 0.000000e+00 : f32
    %104 = vector.broadcast %cst_51 : f32 to vector<16x128xf32>
    %105 = arith.maximumf %103, %104 : vector<16x128xf32>
    %106 = arith.subf %99, %105 : vector<16x128xf32>
    %cst_52 = arith.constant -0.0285450853 : f32
    %107 = vector.broadcast %cst_52 : f32 to vector<16x128xf32>
    %108 = arith.mulf %7, %107 : vector<16x128xf32>
    %cst_53 = arith.constant -0.0571434312 : f32
    %109 = vector.broadcast %cst_53 : f32 to vector<16x128xf32>
    %110 = arith.addf %108, %109 : vector<16x128xf32>
    %cst_54 = arith.constant 0.000000e+00 : f32
    %111 = vector.broadcast %cst_54 : f32 to vector<16x128xf32>
    %112 = arith.maximumf %110, %111 : vector<16x128xf32>
    %113 = arith.subf %106, %112 : vector<16x128xf32>
    %cst_55 = arith.constant 0.0947888047 : f32
    %114 = vector.broadcast %cst_55 : f32 to vector<16x128xf32>
    %115 = arith.mulf %7, %114 : vector<16x128xf32>
    %cst_56 = arith.constant 0.156170592 : f32
    %116 = vector.broadcast %cst_56 : f32 to vector<16x128xf32>
    %117 = arith.addf %115, %116 : vector<16x128xf32>
    %cst_57 = arith.constant 0.000000e+00 : f32
    %118 = vector.broadcast %cst_57 : f32 to vector<16x128xf32>
    %119 = arith.maximumf %117, %118 : vector<16x128xf32>
    %120 = arith.subf %113, %119 : vector<16x128xf32>
    %cst_58 = arith.constant 0.119030178 : f32
    %121 = vector.broadcast %cst_58 : f32 to vector<16x128xf32>
    %122 = arith.addf %120, %121 : vector<16x128xf32>
    %cst_59 = arith.constant -3.000000e+01 : f32
    %123 = vector.broadcast %cst_59 : f32 to vector<16x128xf32>
    %124 = arith.maximumf %122, %123 : vector<16x128xf32>
    %cst_60 = arith.constant 0.000000e+00 : f32
    %125 = vector.broadcast %cst_60 : f32 to vector<16x128xf32>
    %126 = arith.subf %125, %124 : vector<16x128xf32>
    %127 = math.exp %126 : vector<16x128xf32>
    %cst_61 = arith.constant 1.000000e+00 : f32
    %128 = vector.broadcast %cst_61 : f32 to vector<16x128xf32>
    %129 = arith.addf %128, %127 : vector<16x128xf32>
    %130 = tpu.reciprocal %129 {approx = true} : vector<16x128xf32> -> vector<16x128xf32>
    %131 = arith.mulf %2, %130 : vector<16x128xf32>
    %c0_62 = arith.constant 0 : index
    %c0_63 = arith.constant 0 : index
    %132 = vector.load %arg3[%c0_62, %c0_63] : memref<128x128xf32, #tpu.memory_space<vmem>>, vector<128x128xf32>
    %cst_64 = arith.constant dense<0.000000e+00> : vector<16x128xf32>
    %133 = tpu.matmul %131, %132, %cst_64 {dimension_numbers = #tpu.dot_dimension_numbers<[1], [0], [0], [1], [0, 0, 1, 1], [], []>} : vector<16x128xf32>, vector<128x128xf32>, vector<16x128xf32> -> vector<16x128xf32>
    %134 = arith.mulf %133, %133 : vector<16x128xf32>
    %c0_65 = arith.constant 0 : index
    %c0_66 = arith.constant 0 : index
    %135 = vector.load %arg4[%c0_65, %c0_66] : memref<128x16xf32, #tpu.memory_space<vmem>>, vector<128x16xf32>
    %cst_67 = arith.constant dense<0.000000e+00> : vector<16x16xf32>
    %136 = tpu.matmul %134, %135, %cst_67 {dimension_numbers = #tpu.dot_dimension_numbers<[1], [0], [0], [1], [0, 0, 1, 1], [], []>} : vector<16x128xf32>, vector<128x16xf32>, vector<16x16xf32> -> vector<16x16xf32>
    %c0_68 = arith.constant 0 : index
    %c0_69 = arith.constant 0 : index
    %137 = vector.load %arg5[%c0_68, %c0_69] : memref<16x128xf32, #tpu.memory_space<vmem>>, vector<16x128xf32>
    %cst_70 = arith.constant dense<0.000000e+00> : vector<16x128xf32>
    %138 = tpu.matmul %136, %137, %cst_70 {dimension_numbers = #tpu.dot_dimension_numbers<[1], [0], [0], [1], [0, 0, 1, 1], [], []>} : vector<16x16xf32>, vector<16x128xf32>, vector<16x128xf32> -> vector<16x128xf32>
    %cst_71 = arith.constant 0.000000e+00 : f32
    %139 = vector.broadcast %cst_71 : f32 to vector<16x128xf32>
    %cst_72 = arith.constant 0.0242446419 : f32
    %140 = vector.broadcast %cst_72 : f32 to vector<16x128xf32>
    %141 = arith.mulf %138, %140 : vector<16x128xf32>
    %cst_73 = arith.constant -0.0749791786 : f32
    %142 = vector.broadcast %cst_73 : f32 to vector<16x128xf32>
    %143 = arith.addf %141, %142 : vector<16x128xf32>
    %cst_74 = arith.constant 0.000000e+00 : f32
    %144 = vector.broadcast %cst_74 : f32 to vector<16x128xf32>
    %145 = arith.maximumf %143, %144 : vector<16x128xf32>
    %146 = arith.addf %139, %145 : vector<16x128xf32>
    %cst_75 = arith.constant 0.138366416 : f32
    %147 = vector.broadcast %cst_75 : f32 to vector<16x128xf32>
    %148 = arith.mulf %138, %147 : vector<16x128xf32>
    %cst_76 = arith.constant -0.147790715 : f32
    %149 = vector.broadcast %cst_76 : f32 to vector<16x128xf32>
    %150 = arith.addf %148, %149 : vector<16x128xf32>
    %cst_77 = arith.constant 0.000000e+00 : f32
    %151 = vector.broadcast %cst_77 : f32 to vector<16x128xf32>
    %152 = arith.maximumf %150, %151 : vector<16x128xf32>
    %153 = arith.addf %146, %152 : vector<16x128xf32>
    %cst_78 = arith.constant -0.0104620196 : f32
    %154 = vector.broadcast %cst_78 : f32 to vector<16x128xf32>
    %155 = arith.mulf %138, %154 : vector<16x128xf32>
    %cst_79 = arith.constant -0.0171153899 : f32
    %156 = vector.broadcast %cst_79 : f32 to vector<16x128xf32>
    %157 = arith.addf %155, %156 : vector<16x128xf32>
    %cst_80 = arith.constant 0.000000e+00 : f32
    %158 = vector.broadcast %cst_80 : f32 to vector<16x128xf32>
    %159 = arith.maximumf %157, %158 : vector<16x128xf32>
    %160 = arith.addf %153, %159 : vector<16x128xf32>
    %cst_81 = arith.constant 0.0236677956 : f32
    %161 = vector.broadcast %cst_81 : f32 to vector<16x128xf32>
    %162 = arith.mulf %138, %161 : vector<16x128xf32>
    %cst_82 = arith.constant 0.0325666294 : f32
    %163 = vector.broadcast %cst_82 : f32 to vector<16x128xf32>
    %164 = arith.addf %162, %163 : vector<16x128xf32>
    %cst_83 = arith.constant 0.000000e+00 : f32
    %165 = vector.broadcast %cst_83 : f32 to vector<16x128xf32>
    %166 = arith.maximumf %164, %165 : vector<16x128xf32>
    %167 = arith.addf %160, %166 : vector<16x128xf32>
    %cst_84 = arith.constant -0.138855606 : f32
    %168 = vector.broadcast %cst_84 : f32 to vector<16x128xf32>
    %169 = arith.mulf %138, %168 : vector<16x128xf32>
    %cst_85 = arith.constant -0.140687272 : f32
    %170 = vector.broadcast %cst_85 : f32 to vector<16x128xf32>
    %171 = arith.addf %169, %170 : vector<16x128xf32>
    %cst_86 = arith.constant 0.000000e+00 : f32
    %172 = vector.broadcast %cst_86 : f32 to vector<16x128xf32>
    %173 = arith.maximumf %171, %172 : vector<16x128xf32>
    %174 = arith.addf %167, %173 : vector<16x128xf32>
    %cst_87 = arith.constant 0.0909522772 : f32
    %175 = vector.broadcast %cst_87 : f32 to vector<16x128xf32>
    %176 = arith.mulf %138, %175 : vector<16x128xf32>
    %cst_88 = arith.constant -0.00600921083 : f32
    %177 = vector.broadcast %cst_88 : f32 to vector<16x128xf32>
    %178 = arith.addf %176, %177 : vector<16x128xf32>
    %cst_89 = arith.constant 0.000000e+00 : f32
    %179 = vector.broadcast %cst_89 : f32 to vector<16x128xf32>
    %180 = arith.maximumf %178, %179 : vector<16x128xf32>
    %181 = arith.subf %174, %180 : vector<16x128xf32>
    %cst_90 = arith.constant -0.14588286 : f32
    %182 = vector.broadcast %cst_90 : f32 to vector<16x128xf32>
    %183 = arith.mulf %138, %182 : vector<16x128xf32>
    %cst_91 = arith.constant -0.186895743 : f32
    %184 = vector.broadcast %cst_91 : f32 to vector<16x128xf32>
    %185 = arith.addf %183, %184 : vector<16x128xf32>
    %cst_92 = arith.constant 0.000000e+00 : f32
    %186 = vector.broadcast %cst_92 : f32 to vector<16x128xf32>
    %187 = arith.maximumf %185, %186 : vector<16x128xf32>
    %188 = arith.subf %181, %187 : vector<16x128xf32>
    %cst_93 = arith.constant 0.101464793 : f32
    %189 = vector.broadcast %cst_93 : f32 to vector<16x128xf32>
    %190 = arith.mulf %138, %189 : vector<16x128xf32>
    %cst_94 = arith.constant -0.0203644857 : f32
    %191 = vector.broadcast %cst_94 : f32 to vector<16x128xf32>
    %192 = arith.addf %190, %191 : vector<16x128xf32>
    %cst_95 = arith.constant 0.000000e+00 : f32
    %193 = vector.broadcast %cst_95 : f32 to vector<16x128xf32>
    %194 = arith.maximumf %192, %193 : vector<16x128xf32>
    %195 = arith.subf %188, %194 : vector<16x128xf32>
    %cst_96 = arith.constant 0.0947036817 : f32
    %196 = vector.broadcast %cst_96 : f32 to vector<16x128xf32>
    %197 = arith.mulf %138, %196 : vector<16x128xf32>
    %cst_97 = arith.constant 0.0896353423 : f32
    %198 = vector.broadcast %cst_97 : f32 to vector<16x128xf32>
    %199 = arith.addf %197, %198 : vector<16x128xf32>
    %cst_98 = arith.constant 0.000000e+00 : f32
    %200 = vector.broadcast %cst_98 : f32 to vector<16x128xf32>
    %201 = arith.maximumf %199, %200 : vector<16x128xf32>
    %202 = arith.subf %195, %201 : vector<16x128xf32>
    %cst_99 = arith.constant -0.0335187763 : f32
    %203 = vector.broadcast %cst_99 : f32 to vector<16x128xf32>
    %204 = arith.mulf %138, %203 : vector<16x128xf32>
    %cst_100 = arith.constant 0.0164844375 : f32
    %205 = vector.broadcast %cst_100 : f32 to vector<16x128xf32>
    %206 = arith.addf %204, %205 : vector<16x128xf32>
    %cst_101 = arith.constant 0.000000e+00 : f32
    %207 = vector.broadcast %cst_101 : f32 to vector<16x128xf32>
    %208 = arith.maximumf %206, %207 : vector<16x128xf32>
    %209 = arith.subf %202, %208 : vector<16x128xf32>
    %cst_102 = arith.constant -0.0311046727 : f32
    %210 = vector.broadcast %cst_102 : f32 to vector<16x128xf32>
    %211 = arith.mulf %138, %210 : vector<16x128xf32>
    %cst_103 = arith.constant 0.0297699142 : f32
    %212 = vector.broadcast %cst_103 : f32 to vector<16x128xf32>
    %213 = arith.addf %211, %212 : vector<16x128xf32>
    %cst_104 = arith.constant 0.000000e+00 : f32
    %214 = vector.broadcast %cst_104 : f32 to vector<16x128xf32>
    %215 = arith.maximumf %213, %214 : vector<16x128xf32>
    %216 = arith.subf %209, %215 : vector<16x128xf32>
    %cst_105 = arith.constant 0.0478514954 : f32
    %217 = vector.broadcast %cst_105 : f32 to vector<16x128xf32>
    %218 = arith.mulf %138, %217 : vector<16x128xf32>
    %cst_106 = arith.constant 0.0380565599 : f32
    %219 = vector.broadcast %cst_106 : f32 to vector<16x128xf32>
    %220 = arith.addf %218, %219 : vector<16x128xf32>
    %cst_107 = arith.constant 0.000000e+00 : f32
    %221 = vector.broadcast %cst_107 : f32 to vector<16x128xf32>
    %222 = arith.maximumf %220, %221 : vector<16x128xf32>
    %223 = arith.subf %216, %222 : vector<16x128xf32>
    %cst_108 = arith.constant 0.12951991 : f32
    %224 = vector.broadcast %cst_108 : f32 to vector<16x128xf32>
    %225 = arith.mulf %138, %224 : vector<16x128xf32>
    %cst_109 = arith.constant -0.0264279488 : f32
    %226 = vector.broadcast %cst_109 : f32 to vector<16x128xf32>
    %227 = arith.addf %225, %226 : vector<16x128xf32>
    %cst_110 = arith.constant 0.000000e+00 : f32
    %228 = vector.broadcast %cst_110 : f32 to vector<16x128xf32>
    %229 = arith.maximumf %227, %228 : vector<16x128xf32>
    %230 = arith.subf %223, %229 : vector<16x128xf32>
    %cst_111 = arith.constant 0.0955984666 : f32
    %231 = vector.broadcast %cst_111 : f32 to vector<16x128xf32>
    %232 = arith.mulf %138, %231 : vector<16x128xf32>
    %cst_112 = arith.constant -0.0678976774 : f32
    %233 = vector.broadcast %cst_112 : f32 to vector<16x128xf32>
    %234 = arith.addf %232, %233 : vector<16x128xf32>
    %cst_113 = arith.constant 0.000000e+00 : f32
    %235 = vector.broadcast %cst_113 : f32 to vector<16x128xf32>
    %236 = arith.maximumf %234, %235 : vector<16x128xf32>
    %237 = arith.subf %230, %236 : vector<16x128xf32>
    %cst_114 = arith.constant 0.0499801449 : f32
    %238 = vector.broadcast %cst_114 : f32 to vector<16x128xf32>
    %239 = arith.mulf %138, %238 : vector<16x128xf32>
    %cst_115 = arith.constant 1.928080e-04 : f32
    %240 = vector.broadcast %cst_115 : f32 to vector<16x128xf32>
    %241 = arith.addf %239, %240 : vector<16x128xf32>
    %cst_116 = arith.constant 0.000000e+00 : f32
    %242 = vector.broadcast %cst_116 : f32 to vector<16x128xf32>
    %243 = arith.maximumf %241, %242 : vector<16x128xf32>
    %244 = arith.subf %237, %243 : vector<16x128xf32>
    %cst_117 = arith.constant 0.0309233554 : f32
    %245 = vector.broadcast %cst_117 : f32 to vector<16x128xf32>
    %246 = arith.mulf %138, %245 : vector<16x128xf32>
    %cst_118 = arith.constant 0.0782193691 : f32
    %247 = vector.broadcast %cst_118 : f32 to vector<16x128xf32>
    %248 = arith.addf %246, %247 : vector<16x128xf32>
    %cst_119 = arith.constant 0.000000e+00 : f32
    %249 = vector.broadcast %cst_119 : f32 to vector<16x128xf32>
    %250 = arith.maximumf %248, %249 : vector<16x128xf32>
    %251 = arith.subf %244, %250 : vector<16x128xf32>
    %cst_120 = arith.constant 0.0143691301 : f32
    %252 = vector.broadcast %cst_120 : f32 to vector<16x128xf32>
    %253 = arith.addf %251, %252 : vector<16x128xf32>
    %cst_121 = arith.constant -3.000000e+01 : f32
    %254 = vector.broadcast %cst_121 : f32 to vector<16x128xf32>
    %255 = arith.maximumf %253, %254 : vector<16x128xf32>
    %cst_122 = arith.constant 0.000000e+00 : f32
    %256 = vector.broadcast %cst_122 : f32 to vector<16x128xf32>
    %257 = arith.subf %256, %255 : vector<16x128xf32>
    %258 = math.exp %257 : vector<16x128xf32>
    %cst_123 = arith.constant 1.000000e+00 : f32
    %259 = vector.broadcast %cst_123 : f32 to vector<16x128xf32>
    %260 = arith.addf %259, %258 : vector<16x128xf32>
    %261 = tpu.reciprocal %260 {approx = true} : vector<16x128xf32> -> vector<16x128xf32>
    %262 = arith.mulf %133, %261 : vector<16x128xf32>
    %263 = arith.addf %0, %262 : vector<16x128xf32>
    %c0_124 = arith.constant 0 : index
    %c0_125 = arith.constant 0 : index
    %264 = vector.load %arg6[%c0_124, %c0_125] : memref<16x128xf32, #tpu.memory_space<vmem>>, vector<16x128xf32>
    tpu.vector_store %arg6[%c0_124, %c0_125], %263 {strides = array<i32>} : memref<16x128xf32, #tpu.memory_space<vmem>>, vector<16x128xf32>,
    return
  }
  func.func @transform_0(%arg0: i32) -> (i32, i32) {
    %c0_i32 = arith.constant 0 : i32
    %c0_i32_0 = arith.constant 0 : i32
    return %arg0, %c0_i32 : i32, i32
  }
  func.func @transform_1(%arg0: i32) -> (i32, i32) {
    %c0_i32 = arith.constant 0 : i32
    %c0_i32_0 = arith.constant 0 : i32
    %c0_i32_1 = arith.constant 0 : i32
    return %c0_i32, %c0_i32_0 : i32, i32
  }
  func.func @transform_2(%arg0: i32) -> (i32, i32) {
    %c0_i32 = arith.constant 0 : i32
    %c0_i32_0 = arith.constant 0 : i32
    %c0_i32_1 = arith.constant 0 : i32
    return %c0_i32, %c0_i32_0 : i32, i32
  }
  func.func @transform_3(%arg0: i32) -> (i32, i32) {
    %c0_i32 = arith.constant 0 : i32
    %c0_i32_0 = arith.constant 0 : i32
    %c0_i32_1 = arith.constant 0 : i32
    return %c0_i32, %c0_i32_0 : i32, i32
  }
  func.func @transform_4(%arg0: i32) -> (i32, i32) {
    %c0_i32 = arith.constant 0 : i32
    %c0_i32_0 = arith.constant 0 : i32
    %c0_i32_1 = arith.constant 0 : i32
    return %c0_i32, %c0_i32_0 : i32, i32
  }
  func.func @transform_5(%arg0: i32) -> (i32, i32) {
    %c0_i32 = arith.constant 0 : i32
    %c0_i32_0 = arith.constant 0 : i32
    return %arg0, %c0_i32 : i32, i32
  }
}

</mosaic_0001>

<bundles_post_ra>
// kernel: tpu_custom_call.1
= control target key start
LH: loop header
LB: loop body
LE: loop exit
PB: predicated region body
PF: predicated region fallthrough
CT: control target
= control target key end

     0   :  { %10 = vsyncpa [#allocation3], 0  ;;  %s1546_s0 = inlined_call_operand.vmem [shape: f32[16,128], index: 0, kind: input, shape index: {}]   ;;  %s1547_s1 = inlined_call_operand.vmem [shape: f32[128,128], index: 1, kind: input, shape index: {}]   ;;  %s1548_s2 = inlined_call_operand.hbm [shape: f32[128,128], index: 2, kind: input, shape index: {}]   ;;  %s1549_s3 = inlined_call_operand.vmem [shape: f32[128,16], index: 3, kind: input, shape index: {}]   ;;  %s1550_s4 = inlined_call_operand.hbm [shape: f32[16,128], index: 4, kind: input, shape index: {}]   ;;  %s1551_s5 = inlined_call_operand.hbm [shape: f32[16,128], index: 5, kind: output, shape index: {}]  }
   0x1   :  { %11 = vsyncpa [#allocation6], 0 }
   0x2   :  { %12 = vsyncpa [#allocation4], 0  ;;  %s1203_s18 = smov [#allocation2]  }
   0x3   :  { %s22_s19 = sshll.u32 %s1203_s18, 4  ;;  %s23_s19 = int_to_ptr.vmem [resolvable:$true] %s22_s19 }
   0x4   :  { %s1145_s20 = scalar_lea.vmem %s23_s19, 2048  ;;  %p1150_p1 = scmp.lt.s32.totalorder %s23_s19, %s23_s19 }
   0x5   :  { %p1146_p0 = scmp.ne.s32.totalorder %s23_s19, %s1145_s20  ;;  %p1151_p2 = scmp.lt.s32.totalorder %s1145_s20, %s1145_s20 }
   0x7   :  { %p1152_p3 = por %p1151_p2, %p1150_p1 }
   0x9   :  { %p1153_p4 = pnand %p1152_p3, %p1146_p0 }
   0xb   :  { %1156 = shalt.err (!%p1153_p4)
}
   0xc   :  { %s1204_s21 = smov 128   ;;  %s1205_s22 = smov 8  }
   0xd   :  { %28 = dma.hbm_to_vmem [thread:$0]  %s1548_s2, 2048, %s23_s19, [#allocation3], %s1204_s21, %s1204_s21, %s1205_s22  }
   0xe   :  { %s1206_s25 = smov [#allocation5]  }
   0xf   :  { %s36_s26 = sshll.u32 %s1206_s25, 4  ;;  %s37_s26 = int_to_ptr.vmem [resolvable:$true] %s36_s26 }
  0x10   :  { %s1165_s27 = scalar_lea.vmem %s37_s26, 256  ;;  %p1170_p6 = scmp.lt.s32.totalorder %s37_s26, %s37_s26 }
  0x11   :  { %p1166_p5 = scmp.ne.s32.totalorder %s37_s26, %s1165_s27  ;;  %p1171_p7 = scmp.lt.s32.totalorder %s1165_s27, %s1165_s27 }
  0x13   :  { %p1172_p8 = por %p1171_p7, %p1170_p6 }
  0x15   :  { %p1173_p9 = pnand %p1172_p8, %p1166_p5 }
  0x17   :  { %1176 = shalt.err (!%p1173_p9)
}
  0x18   :  { %42 = dma.hbm_to_vmem [thread:$0]  %s1550_s4, 256, %s37_s26, [#allocation6], %s1204_s21, %s1204_s21, %s1205_s22  }
  0x19   :  { %1197 = dma.done.wait [#allocation3], 2048  }
  0x1a   :  { %1198 = vsyncadd [#allocation3], 4294965248 }
  0x1b   :  { %1199 = dma.done.wait [#allocation6], 256  }
  0x1c   :  { %1200 = vsyncadd [#allocation6], 4294967040  ;;  %v66_v0 = vld [vmem:[%s1547_s1 + $0x78] sm:$0xff]  ;;  %v65_v1 = vld [vmem:[%s1547_s1 + $0x70] sm:$0xff]  ;;  %vm237_vm0 = vcmask 130048  }
  0x1d   :  { %962 = vmatprep.subr.mxu0 %v66_v0  ;;  %v64_v2 = vld [vmem:[%s1547_s1 + $0x68] sm:$0xff]  ;;  %v63_v3 = vld [vmem:[%s1547_s1 + $0x60] sm:$0xff]  ;;  %v62_v5 = vld [vmem:[%s1547_s1 + $0x58] sm:$0xff] }
  0x1e   :  { %963 = vmatpush3.msra.mxu0 %v66_v0  ;;  %v1265_v4 = vld [vmem:[%s1546_s0] sm:$0xff]  ;;  %v1274_v6 = vld [vmem:[%s1549_s3 + $0x78] sm:$0xff]  ;;  %v1279_v7 = vld [vmem:[%s1549_s3 + $0x70] sm:$0xff] }
  0x1f   :  { %964 = vmatprep.subr.mxu0 %v65_v1  ;;  %994 = vmatprep.mubr.f32.mxu0 %v1265_v4  ;;  %v61_v8 = vld [vmem:[%s1547_s1 + $0x50] sm:$0xff]  ;;  %v1289_v9 = vld [vmem:[%s1549_s3 + $0x68] sm:$0xff]  ;;  %v1299_v11 = vld [vmem:[%s1549_s3 + $0x60] sm:$0xff] }
  0x20   :  { %965 = vmatpush3.msra.mxu0 %v65_v1  ;;  %997 = vmatprep.subr.mxu1 %v1274_v6  ;;  %v60_v10 = vld [vmem:[%s1547_s1 + $0x48] sm:$0xff]  ;;  %v59_v12 = vld [vmem:[%s1547_s1 + $0x40] sm:$0xff]  ;;  %v1309_v13 = vld [vmem:[%s1549_s3 + $0x58] sm:$0xff] }
  0x21   :  { %966 = vmatprep.subr.mxu0 %v64_v2  ;;  %998 = vmatpush3.msra.mxu1 %v1274_v6  ;;  %v58_v14 = vld [vmem:[%s1547_s1 + $0x38] sm:$0xff]  ;;  %v1319_v15 = vld [vmem:[%s1549_s3 + $0x50] sm:$0xff]  ;;  %v1329_v17 = vld [vmem:[%s1549_s3 + $0x48] sm:$0xff] }
  0x22   :  { %967 = vmatpush3.msra.mxu0 %v64_v2  ;;  %999 = vmatprep.subr.mxu1 %v1279_v7  ;;  %v57_v16 = vld [vmem:[%s1547_s1 + $0x30] sm:$0xff]  ;;  %v56_v18 = vld [vmem:[%s1547_s1 + $0x28] sm:$0xff]  ;;  %v1339_v19 = vld [vmem:[%s1549_s3 + $0x40] sm:$0xff] }
  0x23   :  { %968 = vmatprep.subr.mxu0 %v63_v3  ;;  %1000 = vmatpush3.msra.mxu1 %v1279_v7  ;;  %v55_v20 = vld [vmem:[%s1547_s1 + $0x20] sm:$0xff]  ;;  %v1349_v21 = vld [vmem:[%s1549_s3 + $0x38] sm:$0xff]  ;;  %v1359_v23 = vld [vmem:[%s1549_s3 + $0x30] sm:$0xff] }
  0x24   :  { %969 = vmatpush3.msra.mxu0 %v63_v3  ;;  %1001 = vmatprep.subr.mxu1 %v1289_v9  ;;  %v54_v22 = vld [vmem:[%s1547_s1 + $0x18] sm:$0xff]  ;;  %v53_v24 = vld [vmem:[%s1547_s1 + $0x10] sm:$0xff]  ;;  %v1369_v25 = vld [vmem:[%s1549_s3 + $0x28] sm:$0xff] }
  0x25   :  { %970 = vmatprep.subr.mxu0 %v62_v5  ;;  %1002 = vmatpush3.msra.mxu1 %v1289_v9  ;;  %v52_v26 = vld [vmem:[%s1547_s1 + $0x8] sm:$0xff]  ;;  %v1379_v27 = vld [vmem:[%s1549_s3 + $0x20] sm:$0xff]  ;;  %v147_v29 = vld [vmem:[%s1549_s3 + $0x18] sm:$0xff] }
  0x26   :  { %971 = vmatpush3.msra.mxu0 %v62_v5  ;;  %1003 = vmatprep.subr.mxu1 %v1299_v11  ;;  %v51_v28 = vld [vmem:[%s1547_s1] sm:$0xff]  ;;  %v1393_v30 = vld [vmem:[%s1546_s0 + $0x8] sm:$0xff]  ;;  %v146_v31 = vld [vmem:[%s1549_s3 + $0x10] sm:$0xff] }
  0x27   :  { %972 = vmatprep.subr.mxu0 %v61_v8  ;;  %1004 = vmatpush3.msra.mxu1 %v1299_v11  ;;  %v145_v32 = vld [vmem:[%s1549_s3 + $0x8] sm:$0xff]  ;;  %v144_v33 = vld [vmem:[%s1549_s3] sm:$0xff]  ;;  %v478_v42 = vld [vmem:[#allocation2 + $0x78] sm:$0xff]  ;;  %s1207_s3 = smov [#allocation7]  }
  0x28   :  { %973 = vmatpush3.msra.mxu0 %v61_v8  ;;  %1005 = vmatprep.subr.mxu1 %v1309_v13  ;;  %v1406_v34 = vld [vmem:[#allocation5 + $0x8] sm:$0xff]  ;;  %v1418_v39 = vld [vmem:[#allocation5] sm:$0xff]  ;;  %v477_v43 = vld [vmem:[#allocation2 + $0x70] sm:$0xff]  ;;  %s865_s19 = sshll.u32 %s1207_s3, 4  ;;  %s866_s19 = int_to_ptr.vmem [resolvable:$true] %s865_s19 }
  0x29   :  { %974 = vmatprep.subr.mxu0 %v60_v10  ;;  %1006 = vmatpush3.msra.mxu1 %v1309_v13  ;;  %v476_v44 = vld [vmem:[#allocation2 + $0x68] sm:$0xff]  ;;  %v475_v45 = vld [vmem:[#allocation2 + $0x60] sm:$0xff]  ;;  %v474_v46 = vld [vmem:[#allocation2 + $0x58] sm:$0xff]  ;;  %s1177_s20 = scalar_lea.vmem %s866_s19, 256  ;;  %p1182_p11 = scmp.lt.s32.totalorder %s866_s19, %s866_s19 }
  0x2a   :  { %975 = vmatpush3.msra.mxu0 %v60_v10  ;;  %1007 = vmatprep.subr.mxu1 %v1319_v15  ;;  %v473_v47 = vld [vmem:[#allocation2 + $0x50] sm:$0xff]  ;;  %v472_v48 = vld [vmem:[#allocation2 + $0x48] sm:$0xff]  ;;  %v471_v49 = vld [vmem:[#allocation2 + $0x40] sm:$0xff]  ;;  %p1178_p10 = scmp.ne.s32.totalorder %s866_s19, %s1177_s20  ;;  %p1183_p12 = scmp.lt.s32.totalorder %s1177_s20, %s1177_s20 }
  0x2b   :  { %976 = vmatprep.subr.mxu0 %v59_v12  ;;  %1008 = vmatpush3.msra.mxu1 %v1319_v15  ;;  %v470_v50 = vld [vmem:[#allocation2 + $0x38] sm:$0xff]  ;;  %v469_v51 = vld [vmem:[#allocation2 + $0x30] sm:$0xff]  ;;  %v468_v52 = vld [vmem:[#allocation2 + $0x28] sm:$0xff] }
  0x2c   :  { %977 = vmatpush3.msra.mxu0 %v59_v12  ;;  %1009 = vmatprep.subr.mxu1 %v1329_v17  ;;  %v467_v53 = vld [vmem:[#allocation2 + $0x20] sm:$0xff]  ;;  %v466_v54 = vld [vmem:[#allocation2 + $0x18] sm:$0xff]  ;;  %v465_v55 = vld [vmem:[#allocation2 + $0x10] sm:$0xff]  ;;  %p1184_p13 = por %p1183_p12, %p1182_p11 }
  0x2d   :  { %978 = vmatprep.subr.mxu0 %v58_v14  ;;  %1010 = vmatpush3.msra.mxu1 %v1329_v17  ;;  %v464_v56 = vld [vmem:[#allocation2 + $0x8] sm:$0xff]  ;;  %v463_v57 = vld [vmem:[#allocation2] sm:$0xff] }
  0x2e   :  { %979 = vmatpush3.msra.mxu0 %v58_v14  ;;  %1011 = vmatprep.subr.mxu1 %v1339_v19  ;;  %p1185_p0 = pnand %p1184_p13, %p1178_p10 }
  0x2f   :  { %980 = vmatprep.subr.mxu0 %v57_v16  ;;  %1012 = vmatpush3.msra.mxu1 %v1339_v19 }
  0x30   :  { %981 = vmatpush3.msra.mxu0 %v57_v16  ;;  %1013 = vmatprep.subr.mxu1 %v1349_v21 }
  0x31   :  { %982 = vmatprep.subr.mxu0 %v56_v18  ;;  %1014 = vmatpush3.msra.mxu1 %v1349_v21 }
  0x32   :  { %983 = vmatpush3.msra.mxu0 %v56_v18  ;;  %1015 = vmatprep.subr.mxu1 %v1359_v23 }
  0x33   :  { %984 = vmatprep.subr.mxu0 %v55_v20  ;;  %1016 = vmatpush3.msra.mxu1 %v1359_v23 }
  0x34   :  { %985 = vmatpush3.msra.mxu0 %v55_v20  ;;  %1017 = vmatprep.subr.mxu1 %v1369_v25 }
  0x35   :  { %986 = vmatprep.subr.mxu0 %v54_v22  ;;  %1018 = vmatpush3.msra.mxu1 %v1369_v25 }
  0x36   :  { %987 = vmatpush3.msra.mxu0 %v54_v22  ;;  %1019 = vmatprep.subr.mxu1 %v1379_v27 }
  0x37   :  { %988 = vmatprep.subr.mxu0 %v53_v24  ;;  %1020 = vmatpush3.msra.mxu1 %v1379_v27 }
  0x38   :  { %989 = vmatpush3.msra.mxu0 %v53_v24  ;;  %1021 = vmatprep.subr.mxu1 %v147_v29 }
  0x39   :  { %990 = vmatprep.subr.mxu0 %v52_v26  ;;  %1022 = vmatpush3.msra.mxu1 %v147_v29 }
  0x3a   :  { %991 = vmatpush3.msra.mxu0 %v52_v26  ;;  %1023 = vmatprep.subr.mxu1 %v146_v31 }
  0x3b   :  { %992 = vmatprep.subr.mxu0 %v51_v28  ;;  %1024 = vmatpush3.msra.mxu1 %v146_v31 }
  0x3c   :  { %993 = vmatpush3.msra.mxu0 %v51_v28  ;;  %1025 = vmatprep.subr.mxu1 %v145_v32 }
  0x3d   :  { %995 = vmatmul.mubr.f32.vlgmr.msra.gmra.mxu0 %v1393_v30  ;;  %1026 = vmatpush3.msra.mxu1 %v145_v32 }
  0x3e   :  { %1027 = vmatprep.subr.mxu1 %v144_v33  ;;  %1032 = vmatprep.subr.mxu0 %v1406_v34 }
  0x3f   :  { %1028 = vmatpush3.msra.mxu1 %v144_v33  ;;  %1033 = vmatpush3.msra.mxu0 %v1406_v34 }
  0x40   :  { %1034 = vmatprep.subr.mxu0 %v1418_v39  ;;  %1039 = vmatprep.subr.mxu1 %v478_v42 }
  0x41   :  { %1035 = vmatpush3.msra.mxu0 %v1418_v39 }
  0x42   :  { %1074 = vmatprep.subr.mxu0 %v1274_v6 }
  0xfd   :  { %v1410_v35 = vpop.f32.mrf.mxu0 }
  0xfe   :  { %v143_v38 = vmul.f32 %v1410_v35, %v1410_v35 }
  0xff   :  { %v1412_v36 = vpop.f32.mrf.mxu0 }
 0x100   :  { %v142_v37 = vmul.f32 %v1412_v36, %v1412_v36 }
 0x102   :  { %1029 = vmatprep.mubr.f32.mxu1 %v142_v37 }
 0x103   :  { %1030 = vmatmul.mubr.f32.vlgmr.msra.gmra.mxu1 %v143_v38 }
 0x104   :  { %1040 = vmatpush3.msra.mxu1 %v478_v42 }
 0x105   :  { %1041 = vmatprep.subr.mxu1 %v477_v43 }
 0x106   :  { %1042 = vmatpush3.msra.mxu1 %v477_v43 }
 0x107   :  { %1043 = vmatprep.subr.mxu1 %v476_v44 }
 0x108   :  { %1044 = vmatpush3.msra.mxu1 %v476_v44 }
 0x109   :  { %1045 = vmatprep.subr.mxu1 %v475_v45 }
 0x10a   :  { %1046 = vmatpush3.msra.mxu1 %v475_v45 }
 0x10b   :  { %1047 = vmatprep.subr.mxu1 %v474_v46 }
 0x10c   :  { %1048 = vmatpush3.msra.mxu1 %v474_v46 }
 0x10d   :  { %1049 = vmatprep.subr.mxu1 %v473_v47 }
 0x10e   :  { %1050 = vmatpush3.msra.mxu1 %v473_v47 }
 0x10f   :  { %1051 = vmatprep.subr.mxu1 %v472_v48 }
 0x110   :  { %1052 = vmatpush3.msra.mxu1 %v472_v48 }
 0x111   :  { %1053 = vmatprep.subr.mxu1 %v471_v49 }
 0x112   :  { %1054 = vmatpush3.msra.mxu1 %v471_v49 }
 0x113   :  { %1055 = vmatprep.subr.mxu1 %v470_v50 }
 0x114   :  { %1056 = vmatpush3.msra.mxu1 %v470_v50 }
 0x115   :  { %1057 = vmatprep.subr.mxu1 %v469_v51 }
 0x116   :  { %1058 = vmatpush3.msra.mxu1 %v469_v51 }
 0x117   :  { %1059 = vmatprep.subr.mxu1 %v468_v52 }
 0x118   :  { %1060 = vmatpush3.msra.mxu1 %v468_v52 }
 0x119   :  { %1061 = vmatprep.subr.mxu1 %v467_v53 }
 0x11a   :  { %1062 = vmatpush3.msra.mxu1 %v467_v53 }
 0x11b   :  { %1063 = vmatprep.subr.mxu1 %v466_v54 }
 0x11c   :  { %1064 = vmatpush3.msra.mxu1 %v466_v54 }
 0x11d   :  { %1065 = vmatprep.subr.mxu1 %v465_v55 }
 0x11e   :  { %1066 = vmatpush3.msra.mxu1 %v465_v55 }
 0x11f   :  { %1067 = vmatprep.subr.mxu1 %v464_v56 }
 0x120   :  { %1068 = vmatpush3.msra.mxu1 %v464_v56 }
 0x121   :  { %1069 = vmatprep.subr.mxu1 %v463_v57 }
 0x122   :  { %1070 = vmatpush3.msra.mxu1 %v463_v57 }
 0x123   :  { %1109 = vmatprep.subr.mxu1 %v1406_v34 }
 0x1c3   :  { %v1031_v40 = vpop.f32.mrf.mxu1 }
 0x1c5   :  { %v226_v41 = vpop.f32.mrf.mxu1 }
 0x1c6   :  { %1036 = vmatprep.mubr.msk.f32.mxu0 %vm237_vm0, %v226_v41 }
 0x1c7   :  { %1037 = vmatmul.mubr.msk.f32.vlgmr.msra.gmra.mxu0 %vm237_vm0, %v1031_v40 }
 0x1c8   :  { %1075 = vmatpush3.msra.mxu0 %v1274_v6 }
 0x1c9   :  { %1076 = vmatprep.subr.mxu0 %v1279_v7 }
 0x1ca   :  { %1077 = vmatpush3.msra.mxu0 %v1279_v7 }
 0x1cb   :  { %1078 = vmatprep.subr.mxu0 %v1289_v9 }
 0x1cc   :  { %1079 = vmatpush3.msra.mxu0 %v1289_v9 }
 0x1cd   :  { %1080 = vmatprep.subr.mxu0 %v1299_v11 }
 0x1ce   :  { %1081 = vmatpush3.msra.mxu0 %v1299_v11 }
 0x1cf   :  { %1082 = vmatprep.subr.mxu0 %v1309_v13 }
 0x1d0   :  { %1083 = vmatpush3.msra.mxu0 %v1309_v13 }
 0x1d1   :  { %1084 = vmatprep.subr.mxu0 %v1319_v15 }
 0x1d2   :  { %1085 = vmatpush3.msra.mxu0 %v1319_v15 }
 0x1d3   :  { %1086 = vmatprep.subr.mxu0 %v1329_v17 }
 0x1d4   :  { %1087 = vmatpush3.msra.mxu0 %v1329_v17 }
 0x1d5   :  { %1088 = vmatprep.subr.mxu0 %v1339_v19 }
 0x1d6   :  { %1089 = vmatpush3.msra.mxu0 %v1339_v19 }
 0x1d7   :  { %1090 = vmatprep.subr.mxu0 %v1349_v21 }
 0x1d8   :  { %1091 = vmatpush3.msra.mxu0 %v1349_v21 }
 0x1d9   :  { %1092 = vmatprep.subr.mxu0 %v1359_v23 }
 0x1da   :  { %1093 = vmatpush3.msra.mxu0 %v1359_v23 }
 0x1db   :  { %1094 = vmatprep.subr.mxu0 %v1369_v25 }
 0x1dc   :  { %1095 = vmatpush3.msra.mxu0 %v1369_v25 }
 0x1dd   :  { %1096 = vmatprep.subr.mxu0 %v1379_v27 }
 0x1de   :  { %1097 = vmatpush3.msra.mxu0 %v1379_v27 }
 0x1df   :  { %1098 = vmatprep.subr.mxu0 %v147_v29 }
 0x1e0   :  { %1099 = vmatpush3.msra.mxu0 %v147_v29 }
 0x1e1   :  { %1100 = vmatprep.subr.mxu0 %v146_v31 }
 0x1e2   :  { %1101 = vmatpush3.msra.mxu0 %v146_v31 }
 0x1e3   :  { %1102 = vmatprep.subr.mxu0 %v145_v32 }
 0x1e4   :  { %1103 = vmatpush3.msra.mxu0 %v145_v32 }
 0x1e5   :  { %1104 = vmatprep.subr.mxu0 %v144_v33 }
 0x1e6   :  { %1105 = vmatpush3.msra.mxu0 %v144_v33 }
 0x287   :  { %v1449_v58 = vpop.f32.mrf.mxu0 }
 0x288   :  { %v320_v17 = vmul.f32 0.09441726, %v1449_v58  ;;  %v328_v18 = vmul.f32 0.06256862, %v1449_v58  ;;  %v336_v19 = vmul.f32 -0.1249064, %v1449_v58 }
 0x289   :  { %v1451_v59 = vpop.f32.mrf.mxu0  ;;  %v344_v25 = vmul.f32 0.0148380725, %v1449_v58  ;;  %v352_v26 = vmul.f32 -0.08987803, %v1449_v58  ;;  %v360_v37 = vmul.f32 0.15924317, %v1449_v58 }
 0x28a   :  { %v319_v60 = vmul.f32 0.09441726, %v1451_v59  ;;  %v327_v61 = vmul.f32 0.06256862, %v1451_v59  ;;  %v335_v62 = vmul.f32 -0.1249064, %v1451_v59 }
 0x28b   :  { %v343_v63 = vmul.f32 0.0148380725, %v1451_v59  ;;  %v351_v0 = vmul.f32 -0.08987803, %v1451_v59  ;;  %v359_v5 = vmul.f32 0.15924317, %v1451_v59 }
 0x28c   :  { %v321_v1 = vadd.f32 0.05357583, %v319_v60  ;;  %v329_v2 = vadd.f32 0.123360254, %v327_v61  ;;  %v337_v3 = vadd.f32 -0.10209577, %v335_v62 }
 0x28d   :  { %v345_v8 = vadd.f32 0.06304294, %v343_v63  ;;  %v353_v11 = vadd.f32 -0.07596936, %v351_v0  ;;  %v367_v12 = vmul.f32 0.13938664, %v1451_v59 }
 0x28e   :  { %v323_v6 = vmax.f32 %v321_v1, 0.0  ;;  %v331_v7 = vmax.f32 %v329_v2, 0.0  ;;  %v339_v10 = vmax.f32 %v337_v3, 0.0  ;;  %v361_v13 = vadd.f32 0.038213503, %v359_v5 }
 0x28f   :  { %v347_v15 = vmax.f32 %v345_v8, 0.0  ;;  %v375_v16 = vmul.f32 -0.06393009, %v1451_v59  ;;  %v355_v21 = vmax.f32 %v353_v11, 0.0  ;;  %v369_v22 = vadd.f32 -0.080702186, %v367_v12 }
 0x290   :  { %v333_v9 = vadd.f32 %v331_v7, %v323_v6  ;;  %v383_v23 = vmul.f32 -0.013528449, %v1451_v59  ;;  %v363_v24 = vmax.f32 %v361_v13, 0.0  ;;  %v391_v29 = vmul.f32 0.061021246, %v1451_v59 }
 0x291   :  { %v377_v28 = vadd.f32 0.18248585, %v375_v16  ;;  %v322_v31 = vadd.f32 0.05357583, %v320_v17  ;;  %v399_v32 = vmul.f32 0.0019294521, %v1451_v59 }
 0x292   :  { %v341_v14 = vadd.f32 %v339_v10, %v333_v9  ;;  %v330_v33 = vadd.f32 0.123360254, %v328_v18  ;;  %v371_v40 = vmax.f32 %v369_v22, 0.0  ;;  %v385_v41 = vadd.f32 -0.014038326, %v383_v23 }
 0x293   :  { %v324_v42 = vmax.f32 %v322_v31, 0.0  ;;  %v407_v43 = vmul.f32 -0.04552175, %v1451_v59  ;;  %v338_v45 = vadd.f32 -0.10209577, %v336_v19  ;;  %v379_v47 = vmax.f32 %v377_v28, 0.0 }
 0x294   :  { %v349_v20 = vadd.f32 %v347_v15, %v341_v14  ;;  %v332_v44 = vmax.f32 %v330_v33, 0.0  ;;  %v393_v48 = vadd.f32 -0.20193414, %v391_v29  ;;  %v346_v49 = vadd.f32 0.06304294, %v344_v25 }
 0x295   :  { %v340_v51 = vmax.f32 %v338_v45, 0.0  ;;  %v354_v52 = vadd.f32 -0.07596936, %v352_v26  ;;  %v368_v53 = vmul.f32 0.13938664, %v1449_v58  ;;  %v387_v55 = vmax.f32 %v385_v41, 0.0 }
 0x296   :  { %v357_v27 = vadd.f32 %v355_v21, %v349_v20  ;;  %v334_v50 = vadd.f32 %v332_v44, %v324_v42  ;;  %v401_v56 = vadd.f32 0.08062219, %v399_v32  ;;  %v415_v57 = vmul.f32 -0.081446186, %v1451_v59 }
 0x297   :  { %v348_v61 = vmax.f32 %v346_v49, 0.0  ;;  %v362_v62 = vadd.f32 0.038213503, %v360_v37  ;;  %v376_v63 = vmul.f32 -0.06393009, %v1449_v58  ;;  %v395_v1 = vmax.f32 %v393_v48, 0.0 }
 0x298   :  { %v365_v38 = vadd.f32 %v363_v24, %v357_v27  ;;  %v342_v60 = vadd.f32 %v340_v51, %v334_v50  ;;  %v409_v2 = vadd.f32 0.045331296, %v407_v43  ;;  %v423_v3 = vmul.f32 0.19222483, %v1451_v59 }
 0x299   :  { %v356_v6 = vmax.f32 %v354_v52, 0.0  ;;  %v370_v7 = vadd.f32 -0.080702186, %v368_v53  ;;  %v384_v8 = vmul.f32 -0.013528449, %v1449_v58  ;;  %v403_v10 = vmax.f32 %v401_v56, 0.0 }
 0x29a   :  { %v373_v46 = vsub.f32 %v365_v38, %v371_v40  ;;  %v350_v5 = vadd.f32 %v348_v61, %v342_v60  ;;  %v417_v11 = vadd.f32 -0.11703743, %v415_v57  ;;  %v431_v12 = vmul.f32 -0.028545085, %v1451_v59 }
 0x29b   :  { %v364_v14 = vmax.f32 %v362_v62, 0.0  ;;  %v378_v15 = vadd.f32 0.18248585, %v376_v63  ;;  %v392_v16 = vmul.f32 0.061021246, %v1449_v58  ;;  %v411_v18 = vmax.f32 %v409_v2, 0.0 }
 0x29c   :  { %v381_v54 = vsub.f32 %v373_v46, %v379_v47  ;;  %v358_v13 = vadd.f32 %v356_v6, %v350_v5  ;;  %v425_v19 = vadd.f32 -0.07537386, %v423_v3  ;;  %v439_v20 = vmul.f32 0.094788805, %v1451_v59 }
 0x29d   :  { %v372_v22 = vmax.f32 %v370_v7, 0.0  ;;  %v386_v23 = vadd.f32 -0.014038326, %v384_v8  ;;  %v400_v24 = vmul.f32 0.0019294521, %v1449_v58  ;;  %v419_v26 = vmax.f32 %v417_v11, 0.0 }
 0x29e   :  { %v389_v0 = vsub.f32 %v381_v54, %v387_v55  ;;  %v366_v21 = vadd.f32 %v364_v14, %v358_v13  ;;  %v433_v27 = vadd.f32 -0.05714343, %v431_v12  ;;  %v380_v29 = vmax.f32 %v378_v15, 0.0 }
 0x29f   :  { %v394_v31 = vadd.f32 -0.20193414, %v392_v16  ;;  %v408_v32 = vmul.f32 -0.04552175, %v1449_v58  ;;  %v427_v37 = vmax.f32 %v425_v19, 0.0  ;;  %v388_v41 = vmax.f32 %v386_v23, 0.0 }
 0x2a0   :  { %v397_v9 = vsub.f32 %v389_v0, %v395_v1  ;;  %v374_v28 = vsub.f32 %v366_v21, %v372_v22  ;;  %v441_v38 = vadd.f32 0.15617059, %v439_v20  ;;  %v402_v42 = vadd.f32 0.08062219, %v400_v24 }
 0x2a1   :  { %v416_v59 = vmul.f32 -0.081446186, %v1449_v58  ;;  %v435_v44 = vmax.f32 %v433_v27, 0.0  ;;  %v396_v46 = vmax.f32 %v394_v31, 0.0  ;;  %v410_v47 = vadd.f32 0.045331296, %v408_v32 }
 0x2a2   :  { %v405_v17 = vsub.f32 %v397_v9, %v403_v10  ;;  %v382_v40 = vsub.f32 %v374_v28, %v380_v29  ;;  %v424_v48 = vmul.f32 0.19222483, %v1449_v58  ;;  %v443_v50 = vmax.f32 %v441_v38, 0.0 }
 0x2a3   :  { %v404_v52 = vmax.f32 %v402_v42, 0.0  ;;  %v418_v53 = vadd.f32 -0.11703743, %v416_v59  ;;  %v432_v54 = vmul.f32 -0.028545085, %v1449_v58  ;;  %v412_v57 = vmax.f32 %v410_v47, 0.0 }
 0x2a4   :  { %v413_v25 = vsub.f32 %v405_v17, %v411_v18  ;;  %v390_v45 = vsub.f32 %v382_v40, %v388_v41  ;;  %v426_v60 = vadd.f32 -0.07537386, %v424_v48  ;;  %v440_v61 = vmul.f32 0.094788805, %v1449_v58 }
 0x2a5   :  { %v420_v0 = vmax.f32 %v418_v53, 0.0  ;;  %v434_v1 = vadd.f32 -0.05714343, %v432_v54 }
 0x2a6   :  { %v421_v33 = vsub.f32 %v413_v25, %v419_v26  ;;  %v398_v51 = vsub.f32 %v390_v45, %v396_v46  ;;  %v428_v5 = vmax.f32 %v426_v60, 0.0  ;;  %v442_v6 = vadd.f32 0.15617059, %v440_v61 }
 0x2a7   :  { %v436_v9 = vmax.f32 %v434_v1, 0.0 }
 0x2a8   :  { %v429_v43 = vsub.f32 %v421_v33, %v427_v37  ;;  %v406_v56 = vsub.f32 %v398_v51, %v404_v52  ;;  %v444_v12 = vmax.f32 %v442_v6, 0.0 }
 0x2aa   :  { %v437_v49 = vsub.f32 %v429_v43, %v435_v44  ;;  %v414_v63 = vsub.f32 %v406_v56, %v412_v57 }
 0x2ac   :  { %v445_v55 = vsub.f32 %v437_v49, %v443_v50  ;;  %v422_v3 = vsub.f32 %v414_v63, %v420_v0 }
 0x2ae   :  { %v447_v62 = vadd.f32 0.11903018, %v445_v55  ;;  %v430_v8 = vsub.f32 %v422_v3, %v428_v5 }
 0x2b0   :  { %v449_v2 = vmax.f32 %v447_v62, -30.0  ;;  %v438_v11 = vsub.f32 %v430_v8, %v436_v9 }
 0x2b2   :  { %v451_v7 = vsub.f32 0.0, %v449_v2  ;;  %v446_v13 = vsub.f32 %v438_v11, %v444_v12 }
 0x2b4   :  { %v453_v10 = vmul.f32 1.442695, %v451_v7  ;;  %v448_v14 = vadd.f32 0.11903018, %v446_v13 }
 0x2b6   :  { %1121 = vpow2.f32 %v453_v10  ;;  %v450_v15 = vmax.f32 %v448_v14, -30.0 }
 0x2b8   :  { %v452_v16 = vsub.f32 0.0, %v450_v15 }
 0x2ba   :  { %v455_v58 = vmul.f32 1.442695, %v452_v16 }
 0x2bc   :  { %1123 = vpow2.f32 %v455_v58 }
 0x2c3   :  { %v1122_v17 = vpop.eup %1121 }
 0x2c4   :  { %v457_v18 = vadd.f32 1.0, %v1122_v17 }
 0x2c6   :  { %1125 = vrcp.f32 %v457_v18 }
 0x2c9   :  { %v1124_v19 = vpop.eup %1123 }
 0x2ca   :  { %v458_v20 = vadd.f32 1.0, %v1124_v19 }
 0x2cc   :  { %1127 = vrcp.f32 %v458_v20 }
 0x2d3   :  { %v1126_v21 = vpop.eup %1125 }
 0x2d4   :  { %v461_v22 = vmul.f32 %v1126_v21, %v1412_v36 }
 0x2d6   :  { %1071 = vmatprep.mubr.f32.mxu1 %v461_v22 }
 0x2d9   :  { %v1128_v23 = vpop.eup %1127 }
 0x2da   :  { %v462_v24 = vmul.f32 %v1128_v23, %v1410_v35 }
 0x2dc   :  { %1072 = vmatmul.mubr.f32.vlgmr.msra.gmra.mxu1 %v462_v24 }
 0x2dd   :  { %1110 = vmatpush3.msra.mxu1 %v1406_v34 }
 0x2de   :  { %1111 = vmatprep.subr.mxu1 %v1418_v39 }
 0x2df   :  { %1112 = vmatpush3.msra.mxu1 %v1418_v39 }
 0x39c   :  { %v1490_v25 = vpop.f32.mrf.mxu1 }
 0x39d   :  { %v555_v36 = vmul.f32 %v1490_v25, %v1490_v25 }
 0x39e   :  { %v1492_v26 = vpop.f32.mrf.mxu1 }
 0x39f   :  { %v554_v27 = vmul.f32 %v1492_v26, %v1492_v26 }
 0x3a1   :  { %1106 = vmatprep.mubr.f32.mxu0 %v554_v27 }
 0x3a2   :  { %1107 = vmatmul.mubr.f32.vlgmr.msra.gmra.mxu0 %v555_v36 }
 0x462   :  { %v1108_v35 = vpop.f32.mrf.mxu0 }
 0x464   :  { %v622_v28 = vpop.f32.mrf.mxu0 }
 0x465   :  { %1113 = vmatprep.mubr.msk.f32.mxu1 %vm237_vm0, %v622_v28 }
 0x466   :  { %1114 = vmatmul.mubr.msk.f32.vlgmr.msra.gmra.mxu1 %vm237_vm0, %v1108_v35 }
 0x526   :  { %v1500_v34 = vpop.f32.mrf.mxu1 }
 0x527   :  { %v713_v39 = vmul.f32 0.024244642, %v1500_v34  ;;  %v721_v29 = vmul.f32 0.13836642, %v1500_v34  ;;  %v729_v31 = vmul.f32 -0.01046202, %v1500_v34 }
 0x528   :  { %v1505_v32 = vpop.f32.mrf.mxu1  ;;  %v737_v33 = vmul.f32 0.023667796, %v1500_v34  ;;  %v745_v37 = vmul.f32 -0.1388556, %v1500_v34  ;;  %v753_v38 = vmul.f32 0.09095228, %v1500_v34 }
 0x529   :  { %v712_v40 = vmul.f32 0.024244642, %v1505_v32  ;;  %v715_v41 = vadd.f32 -0.07497918, %v713_v39  ;;  %v720_v42 = vmul.f32 0.13836642, %v1505_v32 }
 0x52a   :  { %v723_v59 = vadd.f32 -0.14779072, %v721_v29  ;;  %v728_v43 = vmul.f32 -0.01046202, %v1505_v32  ;;  %v731_v44 = vadd.f32 -0.01711539, %v729_v31 }
 0x52b   :  { %v714_v45 = vadd.f32 -0.07497918, %v712_v40  ;;  %v717_v46 = vmax.f32 %v715_v41, 0.0  ;;  %v722_v47 = vadd.f32 -0.14779072, %v720_v42 }
 0x52c   :  { %v725_v48 = vmax.f32 %v723_v59, 0.0  ;;  %v730_v49 = vadd.f32 -0.01711539, %v728_v43  ;;  %v736_v50 = vmul.f32 0.023667796, %v1505_v32  ;;  %v733_v56 = vmax.f32 %v731_v44, 0.0 }
 0x52d   :  { %v716_v51 = vmax.f32 %v714_v45, 0.0  ;;  %v724_v52 = vmax.f32 %v722_v47, 0.0  ;;  %v739_v53 = vadd.f32 0.03256663, %v737_v33  ;;  %v744_v54 = vmul.f32 -0.1388556, %v1505_v32 }
 0x52e   :  { %v727_v55 = vadd.f32 %v725_v48, %v717_v46  ;;  %v738_v57 = vadd.f32 0.03256663, %v736_v50  ;;  %v747_v60 = vadd.f32 -0.14068727, %v745_v37  ;;  %v732_v62 = vmax.f32 %v730_v49, 0.0 }
 0x52f   :  { %v726_v61 = vadd.f32 %v724_v52, %v716_v51  ;;  %v746_v63 = vadd.f32 -0.14068727, %v744_v54  ;;  %v752_v0 = vmul.f32 0.09095228, %v1505_v32  ;;  %v741_v3 = vmax.f32 %v739_v53, 0.0 }
 0x530   :  { %v735_v1 = vadd.f32 %v733_v56, %v727_v55  ;;  %v740_v2 = vmax.f32 %v738_v57, 0.0  ;;  %v755_v5 = vadd.f32 -0.006009211, %v753_v38  ;;  %v749_v7 = vmax.f32 %v747_v60, 0.0 }
 0x531   :  { %v734_v6 = vadd.f32 %v732_v62, %v726_v61  ;;  %v754_v8 = vadd.f32 -0.006009211, %v752_v0  ;;  %v760_v9 = vmul.f32 -0.14588286, %v1505_v32  ;;  %v748_v11 = vmax.f32 %v746_v63, 0.0 }
 0x532   :  { %v743_v10 = vadd.f32 %v741_v3, %v735_v1  ;;  %v761_v12 = vmul.f32 -0.14588286, %v1500_v34  ;;  %v768_v13 = vmul.f32 0.10146479, %v1505_v32  ;;  %v757_v15 = vmax.f32 %v755_v5, 0.0 }
 0x533   :  { %v742_v14 = vadd.f32 %v740_v2, %v734_v6  ;;  %v762_v16 = vadd.f32 -0.18689574, %v760_v9  ;;  %v769_v58 = vmul.f32 0.10146479, %v1500_v34  ;;  %v776_v20 = vmul.f32 0.09470368, %v1505_v32 }
 0x534   :  { %v751_v17 = vadd.f32 %v749_v7, %v743_v10  ;;  %v763_v18 = vadd.f32 -0.18689574, %v761_v12  ;;  %v770_v19 = vadd.f32 -0.020364486, %v768_v13  ;;  %v756_v22 = vmax.f32 %v754_v8, 0.0 }
 0x535   :  { %v750_v21 = vadd.f32 %v748_v11, %v742_v14  ;;  %v771_v23 = vadd.f32 -0.020364486, %v769_v58  ;;  %v777_v24 = vmul.f32 0.09470368, %v1500_v34  ;;  %v764_v36 = vmax.f32 %v762_v16, 0.0 }
 0x536   :  { %v759_v27 = vsub.f32 %v751_v17, %v757_v15  ;;  %v765_v35 = vmax.f32 %v763_v18, 0.0  ;;  %v772_v28 = vmax.f32 %v770_v19, 0.0  ;;  %v778_v29 = vadd.f32 0.08963534, %v776_v20 }
 0x537   :  { %v758_v39 = vsub.f32 %v750_v21, %v756_v22  ;;  %v779_v31 = vadd.f32 0.08963534, %v777_v24  ;;  %v784_v33 = vmul.f32 -0.033518776, %v1505_v32  ;;  %v773_v38 = vmax.f32 %v771_v23, 0.0 }
 0x538   :  { %v767_v37 = vsub.f32 %v759_v27, %v765_v35  ;;  %v785_v40 = vmul.f32 -0.033518776, %v1500_v34  ;;  %v792_v41 = vmul.f32 -0.031104673, %v1505_v32  ;;  %v793_v44 = vmul.f32 -0.031104673, %v1500_v34 }
 0x539   :  { %v766_v42 = vsub.f32 %v758_v39, %v764_v36  ;;  %v781_v59 = vmax.f32 %v779_v31, 0.0  ;;  %v786_v43 = vadd.f32 0.016484438, %v784_v33  ;;  %v800_v48 = vmul.f32 0.047851495, %v1505_v32 }
 0x53a   :  { %v775_v45 = vsub.f32 %v767_v37, %v773_v38  ;;  %v787_v46 = vadd.f32 0.016484438, %v785_v40  ;;  %v794_v47 = vadd.f32 0.029769914, %v792_v41  ;;  %v780_v50 = vmax.f32 %v778_v29, 0.0 }
 0x53b   :  { %v774_v49 = vsub.f32 %v766_v42, %v772_v28  ;;  %v795_v51 = vadd.f32 0.029769914, %v793_v44  ;;  %v801_v52 = vmul.f32 0.047851495, %v1500_v34  ;;  %v788_v54 = vmax.f32 %v786_v43, 0.0 }
 0x53c   :  { %v783_v53 = vsub.f32 %v775_v45, %v781_v59  ;;  %v789_v55 = vmax.f32 %v787_v46, 0.0  ;;  %v802_v56 = vadd.f32 0.03805656, %v800_v48  ;;  %v796_v60 = vmax.f32 %v794_v47, 0.0 }
 0x53d   :  { %v782_v57 = vsub.f32 %v774_v49, %v780_v50  ;;  %v803_v61 = vadd.f32 0.03805656, %v801_v52  ;;  %v808_v62 = vmul.f32 0.12951991, %v1505_v32  ;;  %v797_v0 = vmax.f32 %v795_v51, 0.0 }
 0x53e   :  { %v791_v63 = vsub.f32 %v783_v53, %v789_v55  ;;  %v809_v1 = vmul.f32 0.12951991, %v1500_v34  ;;  %v816_v2 = vmul.f32 0.09559847, %v1505_v32  ;;  %v804_v5 = vmax.f32 %v802_v56, 0.0 }
 0x53f   :  { %v790_v3 = vsub.f32 %v782_v57, %v788_v54  ;;  %v810_v6 = vadd.f32 -0.026427949, %v808_v62  ;;  %v817_v7 = vmul.f32 0.09559847, %v1500_v34  ;;  %v805_v9 = vmax.f32 %v803_v61, 0.0 }
 0x540   :  { %v799_v8 = vsub.f32 %v791_v63, %v797_v0  ;;  %v811_v10 = vadd.f32 -0.026427949, %v809_v1  ;;  %v824_v11 = vmul.f32 0.049980145, %v1505_v32  ;;  %v818_v13 = vadd.f32 -0.06789768, %v816_v2 }
 0x541   :  { %v798_v12 = vsub.f32 %v790_v3, %v796_v60  ;;  %v819_v14 = vadd.f32 -0.06789768, %v817_v7  ;;  %v825_v15 = vmul.f32 0.049980145, %v1500_v34  ;;  %v812_v58 = vmax.f32 %v810_v6, 0.0 }
 0x542   :  { %v807_v16 = vsub.f32 %v799_v8, %v805_v9  ;;  %v813_v17 = vmax.f32 %v811_v10, 0.0  ;;  %v826_v19 = vadd.f32 0.000192808, %v824_v11  ;;  %v832_v21 = vmul.f32 0.030923355, %v1505_v32 }
 0x543   :  { %v806_v18 = vsub.f32 %v798_v12, %v804_v5  ;;  %v827_v20 = vadd.f32 0.000192808, %v825_v15  ;;  %v821_v23 = vmax.f32 %v819_v14, 0.0  ;;  %v833_v24 = vmul.f32 0.030923355, %v1500_v34 }
 0x544   :  { %v815_v22 = vsub.f32 %v807_v16, %v813_v17  ;;  %v820_v36 = vmax.f32 %v818_v13, 0.0  ;;  %v834_v35 = vadd.f32 0.07821937, %v832_v21  ;;  %v828_v33 = vmax.f32 %v826_v19, 0.0 }
 0x545   :  { %v814_v27 = vsub.f32 %v806_v18, %v812_v58  ;;  %v829_v39 = vmax.f32 %v827_v20, 0.0  ;;  %v835_v29 = vadd.f32 0.07821937, %v833_v24 }
 0x546   :  { %v823_v28 = vsub.f32 %v815_v22, %v821_v23  ;;  %v836_v41 = vmax.f32 %v834_v35, 0.0 }
 0x547   :  { %v822_v31 = vsub.f32 %v814_v27, %v820_v36  ;;  %v837_v38 = vmax.f32 %v835_v29, 0.0 }
 0x548   :  { %v831_v37 = vsub.f32 %v823_v28, %v829_v39 }
 0x549   :  { %v830_v40 = vsub.f32 %v822_v31, %v828_v33 }
 0x54a   :  { %v839_v42 = vsub.f32 %v831_v37, %v837_v38 }
 0x54b   :  { %v838_v59 = vsub.f32 %v830_v40, %v836_v41 }
 0x54c   :  { %v841_v43 = vadd.f32 0.01436913, %v839_v42 }
 0x54d   :  { %v840_v32 = vadd.f32 0.01436913, %v838_v59 }
 0x54e   :  { %v843_v44 = vmax.f32 %v841_v43, -30.0 }
 0x54f   :  { %v842_v45 = vmax.f32 %v840_v32, -30.0 }
 0x550   :  { %v845_v46 = vsub.f32 0.0, %v843_v44 }
 0x551   :  { %v844_v34 = vsub.f32 0.0, %v842_v45 }
 0x552   :  { %v848_v47 = vmul.f32 1.442695, %v845_v46 }
 0x553   :  { %v846_v48 = vmul.f32 1.442695, %v844_v34 }
 0x554   :  { %1129 = vpow2.f32 %v848_v47 }
 0x555   :  { %1131 = vpow2.f32 %v846_v48 }
 0x561   :  { %v1130_v49 = vpop.eup %1129 }
 0x562   :  { %v1132_v50 = vpop.eup %1131  ;;  %v851_v51 = vadd.f32 1.0, %v1130_v49 }
 0x563   :  { %v850_v52 = vadd.f32 1.0, %v1132_v50 }
 0x564   :  { %1133 = vrcp.f32 %v851_v51 }
 0x565   :  { %1135 = vrcp.f32 %v850_v52 }
 0x571   :  { %v1134_v53 = vpop.eup %1133 }
 0x572   :  { %v1136_v54 = vpop.eup %1135  ;;  %v855_v55 = vmul.f32 %v1134_v53, %v1490_v25 }
 0x573   :  { %v854_v56 = vmul.f32 %v1136_v54, %v1492_v26 }
 0x574   :  { %v857_v57 = vadd.f32 %v855_v55, %v1393_v30 }
 0x575   :  { %v856_v60 = vadd.f32 %v854_v56, %v1265_v4 }
 0x576   :  { %859 = vst [vmem:[#allocation7 + $0x8] sm:$0xff] %v857_v57 }
 0x577   :  { %858 = vst [vmem:[#allocation7] sm:$0xff] %v856_v60 }
 0x578   :  { %1188 = shalt.err (!%p1185_p0)
}
 0x579   :  { %871 = dma.vmem_to_hbm [thread:$0]  %s866_s19, 256, %s1551_s5, [#allocation4], %s1204_s21, %s1204_s21, %s1205_s22  }
 0x57a   :  { %1201 = dma.done.wait [#allocation4], 256  }
 0x57b   :  { %1202 = vsyncadd [#allocation4], 4294967040 }
 0x57c   :  { %875 = vsyncpa [#allocation3], 1 }
 0x57d   :  { %876 = vsyncpa [#allocation6], 1 }
 0x57e   :  { %877 = vsyncpa [#allocation4], 1 }

</bundles_post_ra>
